<compile_context>
chip_gen: v6e
topology: v6e:2x2x1
jax: 0.10.0
libtpu: 0.0.40
codegen_flags: <defaults>
</compile_context>

<pallas_src>
import jax
import jax.numpy as jnp
from jax.experimental import pallas as pl
from jax.experimental.pallas import tpu as pltpu

IMG_SIZE = 64
PATCH_SIZE = 16
IN_CHANS = 1
EMBED_DIM = 128

# Flip to jnp.bfloat16 to feed the MXU in bf16 (main extra lever on v5e and
# for large-batch reuse; accumulation stays f32 via preferred_element_type).
MXU_INPUT_DTYPE = jnp.float32

MAX_TILE_M = 1024  # cap on rows per grid step


def _round_up(x, m):
    return (x + m - 1) // m * m


# ----------------------------- Pallas kernel ------------------------------

def _patch_embed_kernel(p_ref, w_ref, b_ref, o_ref):
    # (tm, K) @ (K, D) + (1, D) -> (tm, D); D = 128 lane-dense output, bias
    # add fused into the matmul epilogue.
    y = jnp.dot(p_ref[...], w_ref[...], preferred_element_type=jnp.float32)
    o_ref[...] = (y + b_ref[...]).astype(o_ref.dtype)


def _pick_tile_m(m):
    """Rows per grid step.

    m <= MAX_TILE_M: a single grid step (this regime is overhead-bound; one
    ~0.35us pipeline step per extra grid point dwarfs the compute, and tiny
    tiles starve the 128/256-wide MXU).  Larger m: balance steps with cdiv so
    no step degenerates to a tiny tile; caller zero-pads m to grid * tm.
    """
    if m <= MAX_TILE_M:
        return _round_up(m, 8)
    n_steps = pl.cdiv(m, MAX_TILE_M)
    return _round_up(pl.cdiv(m, n_steps), 8)


def _patch_proj(patches, w_mat, bias):
    """patches: (M, K), w_mat: (K, D), bias: (D,) -> (M, D) float32."""
    M, K = patches.shape
    K2, D = w_mat.shape
    assert K == K2

    tm = _pick_tile_m(M)
    grid_m = pl.cdiv(M, tm)
    m_pad = grid_m * tm
    if m_pad != M:
        # Zero rows: matmul+bias on them is harmless, sliced off below; keeps
        # every output store a full (8,128)-aligned tile.
        patches = jnp.pad(patches, ((0, m_pad - M), (0, 0)))

    patches = patches.astype(MXU_INPUT_DTYPE)
    w_mat = w_mat.astype(MXU_INPUT_DTYPE)

    out = pl.pallas_call(
        _patch_embed_kernel,
        out_shape=jax.ShapeDtypeStruct((m_pad, D), jnp.float32),
        grid=(grid_m,),
        in_specs=[
            pl.BlockSpec((tm, K), lambda i: (i, 0)),   # activation tile
            pl.BlockSpec((K, D), lambda i: (0, 0)),    # weight: constant index -> VMEM resident
            pl.BlockSpec((1, D), lambda i: (0, 0)),    # bias:   constant index -> VMEM resident
        ],
        out_specs=pl.BlockSpec((tm, D), lambda i: (i, 0)),
        compiler_params=pltpu.CompilerParams(
            dimension_semantics=("parallel",)),
    )(patches, w_mat, bias.reshape(1, D))

    if m_pad != M:
        out = out[:M]
    return out


# ------------------------------ forward -----------------------------------

def patch_embed_forward(params, x):
    """PatchEmbed.forward: x (B, C, H, W) -> (B, num_patches, embed_dim)."""
    B, C, H, W = x.shape
    P = PATCH_SIZE
    Hp, Wp = H // P, W // P

    # im2col (single strided copy done by XLA; see TODO(synk) at top):
    # (B, C, H, W) -> (B, Hp, Wp, C, P, P) -> (B*Hp*Wp, C*P*P)
    patches = x.reshape(B, C, Hp, P, Wp, P)
    patches = patches.transpose(0, 2, 4, 1, 3, 5).reshape(B * Hp * Wp, C * P * P)

    # Conv2d weight (D, C, P, P) -> matmul weight (C*P*P, D), matching the
    # (c, kh, kw) flattening order used for the patches above.
    w_mat = params["conv_w"].reshape(EMBED_DIM, C * P * P).T
    emb = _patch_proj(patches, w_mat, params["conv_b"])        # (B*Hp*Wp, D)

    # rows are already ordered as (b, i, j) == conv.flatten(2).transpose(1, 2)
    return emb.reshape(B, Hp * Wp, EMBED_DIM)


def init_params(key):
    kw, kb = jax.random.split(key)
    return {
        "conv_w": (0.02 * jax.random.normal(
            kw, (EMBED_DIM, IN_CHANS, PATCH_SIZE, PATCH_SIZE))).astype(jnp.float32),
        "conv_b": (0.02 * jax.random.normal(kb, (EMBED_DIM,))).astype(jnp.float32),
    }


# --------------------------- reference (pure JAX) --------------------------

def patch_embed_reference(params, x):
    B = x.shape[0]
    y = jax.lax.conv_general_dilated(
        x, params["conv_w"],
        window_strides=(PATCH_SIZE, PATCH_SIZE), padding="VALID",
        dimension_numbers=("NCHW", "OIHW", "NCHW"))             # (B, D, Hp, Wp)
    y = y + params["conv_b"][None, :, None, None]
    return y.reshape(B, EMBED_DIM, -1).transpose(0, 2, 1)       # (B, Np, D)


if __name__ == "__main__":
    key = jax.random.PRNGKey(0)
    pkey, xkey = jax.random.split(key)
    params = init_params(pkey)
    x = jax.random.normal(
        xkey, (2, IN_CHANS, IMG_SIZE, IMG_SIZE), dtype=jnp.float32)

    out = jax.jit(patch_embed_forward)(params, x)
    out = jax.block_until_ready(out)

    num_patches = (IMG_SIZE // PATCH_SIZE) ** 2
    assert out.shape == (2, num_patches, EMBED_DIM), out.shape
    assert bool(jnp.all(jnp.isfinite(out)))

    ref = patch_embed_reference(params, x)
    assert bool(jnp.allclose(out, ref, atol=2e-2, rtol=2e-2)), (
        float(jnp.max(jnp.abs(out - ref))))

    print("KERNEL_OK")
</pallas_src>

<mosaic_0001>
module attributes {stable_mosaic.version = 11 : i64} {
  func.func @_patch_embed_kernel(%arg0: i32, %arg1: memref<32x256xf32, #tpu.memory_space<vmem>>, %arg2: memref<256x128xf32, #tpu.memory_space<vmem>>, %arg3: memref<1x128xf32, #tpu.memory_space<vmem>>, %arg4: memref<32x128xf32, #tpu.memory_space<vmem>>) attributes {dimension_semantics = [#tpu.dimension_semantics<parallel>], iteration_bounds = array<i64: 1>, scalar_prefetch = 0 : i64, scratch_operands = 0 : i64, tpu.core_type = #tpu.core_type<tc>, window_params = [{transform_indices = @transform_0, window_bounds = array<i64: 32, 256>}, {pipeline_mode = #tpu.pipeline_mode<synchronous>, transform_indices = @transform_1, window_bounds = array<i64: 256, 128>}, {pipeline_mode = #tpu.pipeline_mode<synchronous>, transform_indices = @transform_2, window_bounds = array<i64: 1, 128>}, {transform_indices = @transform_3, window_bounds = array<i64: 32, 128>}]} {
    %c0 = arith.constant 0 : index
    %c0_0 = arith.constant 0 : index
    %0 = vector.load %arg1[%c0, %c0_0] : memref<32x256xf32, #tpu.memory_space<vmem>>, vector<32x256xf32>
    %c0_1 = arith.constant 0 : index
    %c0_2 = arith.constant 0 : index
    %1 = vector.load %arg2[%c0_1, %c0_2] : memref<256x128xf32, #tpu.memory_space<vmem>>, vector<256x128xf32>
    %cst = arith.constant dense<0.000000e+00> : vector<32x128xf32>
    %2 = tpu.matmul %0, %1, %cst {dimension_numbers = #tpu.dot_dimension_numbers<[1], [0], [0], [1], [0, 0, 1, 1], [], []>} : vector<32x256xf32>, vector<256x128xf32>, vector<32x128xf32> -> vector<32x128xf32>
    %c0_3 = arith.constant 0 : index
    %c0_4 = arith.constant 0 : index
    %3 = vector.load %arg3[%c0_3, %c0_4] : memref<1x128xf32, #tpu.memory_space<vmem>>, vector<1x128xf32>
    %4 = vector.broadcast %3 : vector<1x128xf32> to vector<32x128xf32>
    %5 = arith.addf %2, %4 : vector<32x128xf32>
    %c0_5 = arith.constant 0 : index
    %c0_6 = arith.constant 0 : index
    %6 = vector.load %arg4[%c0_5, %c0_6] : memref<32x128xf32, #tpu.memory_space<vmem>>, vector<32x128xf32>
    tpu.vector_store %arg4[%c0_5, %c0_6], %5 {strides = array<i32>} : memref<32x128xf32, #tpu.memory_space<vmem>>, vector<32x128xf32>,
    return
  }
  func.func @transform_0(%arg0: i32) -> (i32, i32) {
    %c0_i32 = arith.constant 0 : i32
    %c0_i32_0 = arith.constant 0 : i32
    return %arg0, %c0_i32 : i32, i32
  }
  func.func @transform_1(%arg0: i32) -> (i32, i32) {
    %c0_i32 = arith.constant 0 : i32
    %c0_i32_0 = arith.constant 0 : i32
    %c0_i32_1 = arith.constant 0 : i32
    return %c0_i32, %c0_i32_0 : i32, i32
  }
  func.func @transform_2(%arg0: i32) -> (i32, i32) {
    %c0_i32 = arith.constant 0 : i32
    %c0_i32_0 = arith.constant 0 : i32
    %c0_i32_1 = arith.constant 0 : i32
    return %c0_i32, %c0_i32_0 : i32, i32
  }
  func.func @transform_3(%arg0: i32) -> (i32, i32) {
    %c0_i32 = arith.constant 0 : i32
    %c0_i32_0 = arith.constant 0 : i32
    return %arg0, %c0_i32 : i32, i32
  }
}

</mosaic_0001>

<bundles_post_ra>
// kernel: patch_embed_forward.1
= control target key start
LH: loop header
LB: loop body
LE: loop exit
PB: predicated region body
PF: predicated region fallthrough
CT: control target
= control target key end

     0   :  { %s418_s0 = inlined_call_operand.vmem [shape: f32[32,256], index: 0, kind: input, shape index: {}]   ;;  %s419_s1 = inlined_call_operand.vmem [shape: f32[256,128], index: 1, kind: input, shape index: {}]   ;;  %s420_s2 = inlined_call_operand.vmem [shape: f32[1,128], index: 2, kind: input, shape index: {}]   ;;  %s421_s3 = inlined_call_operand.hbm [shape: f32[32,128], index: 3, kind: output, shape index: {}]  }
   0x1   :  { %v54_v0 = vld [vmem:[%s419_s1 + $0xf8] sm:$0xff]  ;;  %v53_v2 = vld [vmem:[%s419_s1 + $0xf0] sm:$0xff]  ;;  %v52_v4 = vld [vmem:[%s419_s1 + $0xe8] sm:$0xff] }
   0x2   :  { %v38_v1 = vld [vmem:[%s419_s1 + $0x78] sm:$0xff]  ;;  %168 = vmatprep.subr.mxu0 %v54_v0  ;;  %212 = vmatprep.subr.mxu1 %v54_v0  ;;  %v37_v3 = vld [vmem:[%s419_s1 + $0x70] sm:$0xff]  ;;  %v36_v5 = vld [vmem:[%s419_s1 + $0x68] sm:$0xff] }
   0x3   :  { %169 = vmatpush3.msra.mxu0 %v38_v1  ;;  %228 = vmatpush3.msra.mxu1 %v38_v1  ;;  %v51_v6 = vld [vmem:[%s419_s1 + $0xe0] sm:$0xff]  ;;  %v50_v8 = vld [vmem:[%s419_s1 + $0xd8] sm:$0xff]  ;;  %v49_v10 = vld [vmem:[%s419_s1 + $0xd0] sm:$0xff] }
   0x4   :  { %170 = vmatprep.subr.mxu0 %v53_v2  ;;  %213 = vmatprep.subr.mxu1 %v53_v2  ;;  %v35_v7 = vld [vmem:[%s419_s1 + $0x60] sm:$0xff]  ;;  %v34_v9 = vld [vmem:[%s419_s1 + $0x58] sm:$0xff]  ;;  %v33_v11 = vld [vmem:[%s419_s1 + $0x50] sm:$0xff] }
   0x5   :  { %171 = vmatpush3.msra.mxu0 %v37_v3  ;;  %229 = vmatpush3.msra.mxu1 %v37_v3  ;;  %v48_v12 = vld [vmem:[%s419_s1 + $0xc8] sm:$0xff]  ;;  %v47_v14 = vld [vmem:[%s419_s1 + $0xc0] sm:$0xff] }
   0x6   :  { %172 = vmatprep.subr.mxu0 %v52_v4  ;;  %214 = vmatprep.subr.mxu1 %v52_v4  ;;  %v32_v13 = vld [vmem:[%s419_s1 + $0x48] sm:$0xff]  ;;  %v31_v15 = vld [vmem:[%s419_s1 + $0x40] sm:$0xff] }
   0x7   :  { %173 = vmatpush3.msra.mxu0 %v36_v5  ;;  %230 = vmatpush3.msra.mxu1 %v36_v5 }
   0x8   :  { %174 = vmatprep.subr.mxu0 %v51_v6  ;;  %215 = vmatprep.subr.mxu1 %v51_v6 }
   0x9   :  { %175 = vmatpush3.msra.mxu0 %v35_v7  ;;  %231 = vmatpush3.msra.mxu1 %v35_v7 }
   0xa   :  { %176 = vmatprep.subr.mxu0 %v50_v8  ;;  %216 = vmatprep.subr.mxu1 %v50_v8 }
   0xb   :  { %177 = vmatpush3.msra.mxu0 %v34_v9  ;;  %232 = vmatpush3.msra.mxu1 %v34_v9 }
   0xc   :  { %178 = vmatprep.subr.mxu0 %v49_v10  ;;  %217 = vmatprep.subr.mxu1 %v49_v10 }
   0xd   :  { %179 = vmatpush3.msra.mxu0 %v33_v11  ;;  %233 = vmatpush3.msra.mxu1 %v33_v11 }
   0xe   :  { %180 = vmatprep.subr.mxu0 %v48_v12  ;;  %218 = vmatprep.subr.mxu1 %v48_v12 }
   0xf   :  { %8 = vsyncpa [#allocation3], 0  ;;  %181 = vmatpush3.msra.mxu0 %v32_v13  ;;  %234 = vmatpush3.msra.mxu1 %v32_v13  ;;  %v46_v16 = vld [vmem:[%s419_s1 + $0xb8] sm:$0xff]  ;;  %v45_v18 = vld [vmem:[%s419_s1 + $0xb0] sm:$0xff]  ;;  %s269_s12 = smov [#allocation2]  }
  0x10   :  { %182 = vmatprep.subr.mxu0 %v47_v14  ;;  %219 = vmatprep.subr.mxu1 %v47_v14  ;;  %v30_v17 = vld [vmem:[%s419_s1 + $0x38] sm:$0xff]  ;;  %v29_v19 = vld [vmem:[%s419_s1 + $0x30] sm:$0xff]  ;;  %v44_v20 = vld [vmem:[%s419_s1 + $0xa8] sm:$0xff]  ;;  %s156_s13 = sshll.u32 %s269_s12, 4  ;;  %s157_s13 = int_to_ptr.vmem [resolvable:$true] %s156_s13 }
  0x11   :  { %183 = vmatpush3.msra.mxu0 %v31_v15  ;;  %235 = vmatpush3.msra.mxu1 %v31_v15  ;;  %v28_v21 = vld [vmem:[%s419_s1 + $0x28] sm:$0xff]  ;;  %v43_v22 = vld [vmem:[%s419_s1 + $0xa0] sm:$0xff]  ;;  %v42_v24 = vld [vmem:[%s419_s1 + $0x98] sm:$0xff]  ;;  %p252_p1 = scmp.lt.s32.totalorder %s157_s13, %s157_s13 }
  0x12   :  { %184 = vmatprep.subr.mxu0 %v46_v16  ;;  %220 = vmatprep.subr.mxu1 %v46_v16  ;;  %v27_v23 = vld [vmem:[%s419_s1 + $0x20] sm:$0xff]  ;;  %v26_v25 = vld [vmem:[%s419_s1 + $0x18] sm:$0xff]  ;;  %v41_v26 = vld [vmem:[%s419_s1 + $0x90] sm:$0xff] }
  0x13   :  { %185 = vmatpush3.msra.mxu0 %v30_v17  ;;  %236 = vmatpush3.msra.mxu1 %v30_v17  ;;  %v25_v27 = vld [vmem:[%s419_s1 + $0x10] sm:$0xff]  ;;  %v40_v28 = vld [vmem:[%s419_s1 + $0x88] sm:$0xff]  ;;  %v39_v30 = vld [vmem:[%s419_s1 + $0x80] sm:$0xff] }
  0x14   :  { %186 = vmatprep.subr.mxu0 %v45_v18  ;;  %221 = vmatprep.subr.mxu1 %v45_v18  ;;  %v24_v29 = vld [vmem:[%s419_s1 + $0x8] sm:$0xff]  ;;  %v23_v31 = vld [vmem:[%s419_s1] sm:$0xff]  ;;  %v18_v36 = vld [vmem:[%s418_s0 + $0x18] sm:$0xff] }
  0x15   :  { %187 = vmatpush3.msra.mxu0 %v29_v19  ;;  %237 = vmatpush3.msra.mxu1 %v29_v19  ;;  %v16_v32 = vld [vmem:[%s418_s0 + $0x8] sm:$0xff]  ;;  %v15_v34 = vld [vmem:[%s418_s0] sm:$0xff]  ;;  %v22_v37 = vld [vmem:[%s418_s0 + $0x38] sm:$0xff] }
  0x16   :  { %188 = vmatprep.subr.mxu0 %v44_v20  ;;  %222 = vmatprep.subr.mxu1 %v44_v20  ;;  %v20_v33 = vld [vmem:[%s418_s0 + $0x28] sm:$0xff]  ;;  %v19_v35 = vld [vmem:[%s418_s0 + $0x20] sm:$0xff]  ;;  %v17_v38 = vld [vmem:[%s418_s0 + $0x10] sm:$0xff] }
  0x17   :  { %189 = vmatpush3.msra.mxu0 %v28_v21  ;;  %238 = vmatpush3.msra.mxu1 %v28_v21  ;;  %v21_v39 = vld [vmem:[%s418_s0 + $0x30] sm:$0xff]  ;;  %v167_v42 = vld [vmem:[%s420_s2] ss:$0 sm:$0xff]  ;;  %s247_s0 = scalar_lea.vmem %s157_s13, 512 }
  0x18   :  { %190 = vmatprep.subr.mxu0 %v43_v22  ;;  %223 = vmatprep.subr.mxu1 %v43_v22  ;;  %p248_p0 = scmp.ne.s32.totalorder %s157_s13, %s247_s0  ;;  %p253_p2 = scmp.lt.s32.totalorder %s247_s0, %s247_s0 }
  0x19   :  { %191 = vmatpush3.msra.mxu0 %v27_v23  ;;  %239 = vmatpush3.msra.mxu1 %v27_v23 }
  0x1a   :  { %192 = vmatprep.subr.mxu0 %v42_v24  ;;  %224 = vmatprep.subr.mxu1 %v42_v24  ;;  %p254_p3 = por %p253_p2, %p252_p1 }
  0x1b   :  { %193 = vmatpush3.msra.mxu0 %v26_v25  ;;  %240 = vmatpush3.msra.mxu1 %v26_v25 }
  0x1c   :  { %194 = vmatprep.subr.mxu0 %v41_v26  ;;  %225 = vmatprep.subr.mxu1 %v41_v26  ;;  %p255_p4 = pnand %p254_p3, %p248_p0 }
  0x1d   :  { %195 = vmatpush3.msra.mxu0 %v25_v27  ;;  %241 = vmatpush3.msra.mxu1 %v25_v27 }
  0x1e   :  { %196 = vmatprep.subr.mxu0 %v40_v28  ;;  %226 = vmatprep.subr.mxu1 %v40_v28 }
  0x1f   :  { %197 = vmatpush3.msra.mxu0 %v24_v29  ;;  %242 = vmatpush3.msra.mxu1 %v24_v29 }
  0x20   :  { %198 = vmatprep.subr.mxu0 %v39_v30  ;;  %227 = vmatprep.subr.mxu1 %v39_v30 }
  0x21   :  { %199 = vmatpush3.msra.mxu0 %v23_v31  ;;  %243 = vmatpush3.msra.mxu1 %v23_v31 }
  0x22   :  { %126 = vmatprep.mubr.f32.mxu0 %v16_v32  ;;  %136 = vmatprep.mubr.f32.mxu1 %v20_v33 }
  0x23   :  { %127 = vmatmul.mubr.f32.vlgmr.msra.gmra.mxu0 %v15_v34  ;;  %137 = vmatmul.mubr.f32.vlgmr.msra.gmra.mxu1 %v19_v35 }
  0x24   :  { %131 = vmatprep.mubr.f32.mxu0 %v18_v36  ;;  %141 = vmatprep.mubr.f32.mxu1 %v22_v37 }
  0x27   :  { %132 = vmatmul.mubr.f32.gmra.mxu0 %v17_v38  ;;  %142 = vmatmul.mubr.f32.gmra.mxu1 %v21_v39 }
  0xe3   :  { %v200_v40 = vpop.f32.mrf.mxu0  ;;  %v206_v41 = vpop.f32.mrf.mxu1 }
  0xe5   :  { %v201_v43 = vpop.f32.mrf.mxu0  ;;  %v207_v44 = vpop.f32.mrf.mxu1 }
  0xe6   :  { %v202_v45 = vadd.f32 %v201_v43, %v200_v40  ;;  %v208_v46 = vadd.f32 %v207_v44, %v206_v41 }
  0xe7   :  { %v203_v47 = vpop.f32.mrf.mxu0  ;;  %v209_v48 = vpop.f32.mrf.mxu1 }
  0xe8   :  { %v129_v49 = vadd.f32 %v202_v45, %v167_v42  ;;  %v139_v50 = vadd.f32 %v208_v46, %v167_v42 }
  0xe9   :  { %v204_v51 = vpop.f32.mrf.mxu0  ;;  %v210_v52 = vpop.f32.mrf.mxu1 }
  0xea   :  { %147 = vst [vmem:[#allocation2] sm:$0xff] %v129_v49  ;;  %149 = vst [vmem:[#allocation2 + $0x10] sm:$0xff] %v139_v50  ;;  %v205_v53 = vadd.f32 %v204_v51, %v203_v47  ;;  %v211_v54 = vadd.f32 %v210_v52, %v209_v48 }
  0xec   :  { %v134_v55 = vadd.f32 %v205_v53, %v167_v42  ;;  %v144_v56 = vadd.f32 %v211_v54, %v167_v42 }
  0xee   :  { %148 = vst [vmem:[#allocation2 + $0x8] sm:$0xff] %v134_v55  ;;  %150 = vst [vmem:[#allocation2 + $0x18] sm:$0xff] %v144_v56 }
  0xef   :  { %258 = shalt.err (!%p255_p4)
}
  0xf0   :  { %s270_s2 = smov 128   ;;  %s271_s14 = smov 8  }
  0xf1   :  { %162 = dma.vmem_to_hbm [thread:$0]  %s157_s13, 512, %s421_s3, [#allocation3], %s270_s2, %s270_s2, %s271_s14  }
  0xf2   :  { %267 = dma.done.wait [#allocation3], 512  }
  0xf3   :  { %268 = vsyncadd [#allocation3], 4294966784 }
  0xf4   :  { %166 = vsyncpa [#allocation3], 1 }

</bundles_post_ra>
